<compile_context>
chip_gen: v6e
topology: v6e:2x2x1
jax: 0.10.0
libtpu: 0.0.40
codegen_flags: <defaults>
</compile_context>

<pallas_src>
import jax
import jax.numpy as jnp
from jax.experimental import pallas as pl
from jax.experimental.pallas import tpu as pltpu


# ----------------------------------------------------------------------------
# Kernels.  Grid = (M/tm, N/tn, K/tk); K is the reduction ("arbitrary") axis.
# The output block index is constant across k, so the output tile is resident
# in VMEM for the whole reduction.
# ----------------------------------------------------------------------------
def _mm_kernel(x_ref, w_ref, o_ref):
    """No bias, f32 output: accumulate directly into the resident output tile."""
    k = pl.program_id(2)
    p = jnp.dot(x_ref[...], w_ref[...], preferred_element_type=jnp.float32)

    @pl.when(k == 0)
    def _():
        o_ref[...] = p

    @pl.when(k != 0)
    def _():
        o_ref[...] += p


def _mm_bias_kernel(x_ref, w_ref, b_ref, o_ref):
    """Bias, f32 output: bias folded into the first k step, no scratch."""
    k = pl.program_id(2)
    p = jnp.dot(x_ref[...], w_ref[...], preferred_element_type=jnp.float32)

    @pl.when(k == 0)
    def _():
        o_ref[...] = p + b_ref[...].astype(jnp.float32)  # (1, tn) broadcasts

    @pl.when(k != 0)
    def _():
        o_ref[...] += p


def _mm_kernel_acc(x_ref, w_ref, o_ref, acc_ref):
    """No bias, non-f32 output: f32 scratch accumulator, downcast at the end."""
    k = pl.program_id(2)
    p = jnp.dot(x_ref[...], w_ref[...], preferred_element_type=jnp.float32)

    @pl.when(k == 0)
    def _():
        acc_ref[...] = p

    @pl.when(k != 0)
    def _():
        acc_ref[...] += p

    @pl.when(k == pl.num_programs(2) - 1)
    def _():
        o_ref[...] = acc_ref[...].astype(o_ref.dtype)


def _mm_bias_kernel_acc(x_ref, w_ref, b_ref, o_ref, acc_ref):
    """Bias, non-f32 output."""
    k = pl.program_id(2)
    p = jnp.dot(x_ref[...], w_ref[...], preferred_element_type=jnp.float32)

    @pl.when(k == 0)
    def _():
        acc_ref[...] = p + b_ref[...].astype(jnp.float32)

    @pl.when(k != 0)
    def _():
        acc_ref[...] += p

    @pl.when(k == pl.num_programs(2) - 1)
    def _():
        o_ref[...] = acc_ref[...].astype(o_ref.dtype)


# ----------------------------------------------------------------------------
# Tiling helpers.
# ----------------------------------------------------------------------------
def _round_up(x, m):
    return ((x + m - 1) // m) * m


def _largest_divisor_tile(dim, target, granule):
    """Largest multiple of `granule` that is <= target and divides `dim`
    (precondition: dim % granule == 0)."""
    t = max(granule, (min(target, dim) // granule) * granule)
    while dim % t:
        t -= granule
    return t


def _pick_tile(dim, target, granule):
    """Pick (tile, padded_dim) for a lane/last-two-dims axis.

    Preference order: full extent (no pad, legal for any size) -> exact
    divisor that is a multiple of `granule` (no pad) -> zero-pad (rare: only
    when dim is large AND not a multiple of `granule`)."""
    if dim <= target:
        return dim, dim
    if dim % granule == 0:
        return _largest_divisor_tile(dim, target, granule), dim
    t = max(granule, (target // granule) * granule)
    return t, _round_up(dim, t)


def _vmem_working_set(tm_e, tk_e, tn_e, in_isz, out_isz, use_scratch, has_bias, wbufs):
    b = 2 * tm_e * tk_e * in_isz          # x tiles, double-buffered
    b += wbufs * tk_e * tn_e * in_isz     # weight tiles
    b += 2 * tm_e * tn_e * out_isz        # output tiles, double-buffered
    if use_scratch:
        b += tm_e * tn_e * 4              # f32 accumulator
    if has_bias:
        b += 2 * tn_e * 4                 # bias tiles
    return b


# ----------------------------------------------------------------------------
# Wrapper.
# ----------------------------------------------------------------------------
def lora_offload_linear_forward(
    x,
    weight,
    bias=None,
    *,
    tm=512,
    tn=1024,
    tk=1024,
    compute_dtype="auto",
    weight_buffers="auto",
):
    """Forward of LoRaOffloadLinear: x @ weight (+ bias).

    x: (..., in_features); weight: (in_features, out_features) (already the
    transpose of nn.Linear.weight, as the module stores it); bias:
    (out_features,) or None.

    compute_dtype:
      "auto" (default): stream x/weight to the MXU as bf16 when x is f32
                        (f32 accumulation, output keeps x's dtype),
      None:             no cast — exact dtype path,
      a dtype:          stream at that dtype.
    """
    orig_dtype = x.dtype
    *lead, K = x.shape
    Kw, N = weight.shape
    assert K == Kw, f"in_features mismatch: {K} vs {Kw}"
    M = 1
    for d in lead:
        M *= d
    x2d = x.reshape(M, K)

    if isinstance(compute_dtype, str) and compute_dtype == "auto":
        cdtype = jnp.bfloat16 if orig_dtype == jnp.float32 else orig_dtype
    elif compute_dtype is None:
        cdtype = orig_dtype
    else:
        cdtype = compute_dtype

    if x2d.dtype != cdtype:
        x2d = x2d.astype(cdtype)
    if weight.dtype != cdtype:
        # TODO(synk): in module form, cast & cache the streamed-dtype weight once
        # at init (or on optimizer update) instead of per forward call.
        weight = weight.astype(cdtype)

    in_isz = jnp.dtype(cdtype).itemsize
    out_isz = jnp.dtype(orig_dtype).itemsize
    pack = {4: 8, 2: 16, 1: 32}.get(in_isz, 8)  # native sublane pack for cdtype

    has_bias = bias is not None
    use_scratch = orig_dtype != jnp.float32

    try:
        vmem_cap = int(pltpu.get_tpu_info().vmem_capacity_bytes)
    except Exception:  # pragma: no cover - conservative fallback (v7x per-TC)
        vmem_cap = 64 << 20
    budget = int(0.6 * vmem_cap)  # leave headroom for compiler scratch / spills

    # --- Tile selection: divisor-based (no weight pad in the common case),
    # --- shrunk until the double-buffered working set fits the VMEM budget.
    tm_t, tk_t, tn_t = max(tm, pack), max(tk, 128), max(tn, 128)
    for _ in range(16):
        tk_eff, pK = _pick_tile(K, tk_t, 128)
        tn_eff, pN = _pick_tile(N, tn_t, 128)
        if M <= tm_t:
            tm_eff = _round_up(M, pack)   # only x ever gets padded along M
            pM = tm_eff
        else:
            tm_eff = max(pack, (tm_t // pack) * pack)
            pM = _round_up(M, tm_eff)
        ws = _vmem_working_set(tm_eff, tk_eff, tn_eff, in_isz, out_isz,
                               use_scratch, has_bias, 2)
        if ws <= budget:
            break
        if tn_t > 128 and tn_t >= tk_t:
            tn_t //= 2
        elif tk_t > 128:
            tk_t //= 2
        elif tm_t > pack:
            tm_t = max(pack, tm_t // 2)
        else:
            break

    # --- Padding (x along M/K is cheap; weight pad only in the rare
    # --- large-and-not-multiple-of-128 case; zero-padding K is exact).
    if (pM, pK) != (M, K):
        x2d = jnp.pad(x2d, ((0, pM - M), (0, pK - K)))
    if (pK, pN) != (K, N):
        weight = jnp.pad(weight, ((0, pK - K), (0, pN - N)))
    if has_bias:
        bias2d = bias.reshape(1, N)
        if pN != N:
            bias2d = jnp.pad(bias2d, ((0, 0), (0, pN - N)))

    grid = (pM // tm_eff, pN // tn_eff, pK // tk_eff)
    nm, nn, nk = grid

    # --- Weight buffering: tiny-M (decode / LoRA) shapes are HBM-bound on
    # --- streaming the weight; 3-deep buffering hides exposed DMA latency.
    wbufs = 2
    if isinstance(weight_buffers, str) and weight_buffers == "auto":
        if nm == 1 and nn * nk >= 3:
            ws3 = _vmem_working_set(tm_eff, tk_eff, tn_eff, in_isz, out_isz,
                                    use_scratch, has_bias, 3)
            if ws3 <= budget:
                wbufs = 3
    elif weight_buffers is not None:
        wbufs = int(weight_buffers)

    w_spec_kwargs = {}
    if wbufs != 2:
        w_spec_kwargs["pipeline_mode"] = pl.Buffered(wbufs)

    in_specs = [
        pl.BlockSpec((tm_eff, tk_eff), lambda i, j, k: (i, k)),                  # x
        pl.BlockSpec((tk_eff, tn_eff), lambda i, j, k: (k, j), **w_spec_kwargs), # w
    ]
    operands = [x2d, weight]
    if has_bias:
        in_specs.append(pl.BlockSpec((1, tn_eff), lambda i, j, k: (0, j)))
        operands.append(bias2d)

    # Advisory cost estimate (x re-read per j block, weight per i block).
    bytes_accessed = (
        pM * pK * in_isz * nn
        + pK * pN * in_isz * nm
        + pM * pN * out_isz
    )
    if has_bias:
        bytes_accessed += pN * jnp.dtype(bias.dtype).itemsize * nm
    cost = pl.CostEstimate(flops=2 * pM * pN * pK, transcendentals=0,
                           bytes_accessed=int(bytes_accessed))

    if use_scratch:
        kernel = _mm_bias_kernel_acc if has_bias else _mm_kernel_acc
        scratch_shapes = [pltpu.VMEM((tm_eff, tn_eff), jnp.float32)]
    else:
        kernel = _mm_bias_kernel if has_bias else _mm_kernel
        scratch_shapes = []

    ws_final = _vmem_working_set(tm_eff, tk_eff, tn_eff, in_isz, out_isz,
                                 use_scratch, has_bias, wbufs)
    vmem_limit = max(32 << 20, 2 * ws_final)
    vmem_limit = min(vmem_limit, int(0.85 * vmem_cap))

    out2d = pl.pallas_call(
        kernel,
        out_shape=jax.ShapeDtypeStruct((pM, pN), orig_dtype),
        grid_spec=pltpu.PrefetchScalarGridSpec(
            num_scalar_prefetch=0,
            grid=grid,
            in_specs=in_specs,
            out_specs=pl.BlockSpec((tm_eff, tn_eff), lambda i, j, k: (i, j)),
            scratch_shapes=scratch_shapes,
        ),
        compiler_params=pltpu.CompilerParams(
            dimension_semantics=("parallel", "parallel", "arbitrary"),
            vmem_limit_bytes=int(vmem_limit),
        ),
        cost_estimate=cost,
    )(*operands)

    if (pM, pN) != (M, N):
        out2d = out2d[:M, :N]
    return out2d.reshape(*lead, N)


# ----------------------------------------------------------------------------
# Self-test.
# ----------------------------------------------------------------------------
if __name__ == "__main__":
    # Small shapes consistent with the module: batch=2, seq=8, in=256, out=256.
    B, S, IN, OUT = 2, 8, 256, 256

    key = jax.random.PRNGKey(0)
    kx, kw, kb, ka = jax.random.split(key, 4)

    x = jax.random.normal(kx, (B, S, IN), dtype=jnp.float32)
    # LoRaOffloadLinear stores weight as nn.Linear.weight.t(): (in, out).
    weight = jax.random.normal(kw, (IN, OUT), dtype=jnp.float32) * 0.02
    bias = jax.random.normal(kb, (OUT,), dtype=jnp.float32) * 0.1

    ref = (
        jnp.einsum("bsk,kn->bsn", x, weight, precision=jax.lax.Precision.HIGHEST)
        + bias
    )

    # 1) Exact f32 path (no downcast).
    out_f32 = jax.block_until_ready(
        lora_offload_linear_forward(x, weight, bias, compute_dtype=None)
    )
    assert out_f32.shape == (B, S, OUT)
    assert jnp.allclose(out_f32, ref, atol=5e-3, rtol=5e-3), "f32 path mismatch"

    # 2) Default bf16-streamed MXU path (f32 accumulation, f32 output).
    out_bf16 = jax.block_until_ready(lora_offload_linear_forward(x, weight, bias))
    assert out_bf16.dtype == jnp.float32
    assert jnp.allclose(out_bf16, ref, atol=3e-2, rtol=3e-2), "bf16 path mismatch"

    # 3) Multi-block reduction grid + triple-buffered weight stream (forces
    #    nk=2, nn=2 with tiny tiles so the Buffered(3) / accumulate-into-output
    #    paths are exercised on small data).
    out_small = jax.block_until_ready(
        lora_offload_linear_forward(x, weight, bias, tk=128, tn=128)
    )
    assert jnp.allclose(out_small, ref, atol=3e-2, rtol=3e-2), "tiled path mismatch"

    # 4) LoRA-rank shaped matmul (resident weight, single k/j block, no bias).
    rank = 16
    a_w = jax.random.normal(ka, (IN, rank), dtype=jnp.float32) * 0.02
    ref_a = jnp.einsum("bsk,kr->bsr", x, a_w, precision=jax.lax.Precision.HIGHEST)
    out_a = jax.block_until_ready(lora_offload_linear_forward(x, a_w, None))
    assert out_a.shape == (B, S, rank)
    assert jnp.allclose(out_a, ref_a, atol=3e-2, rtol=3e-2), "rank path mismatch"

    # TODO(synk): the backward-path Adam offload / D2H-H2D pinned-buffer comm
    # scheduling in ParallelOffloadAdamMMOptim is host/stream orchestration,
    # not forward compute, and is intentionally not ported.
    print("KERNEL_OK")
</pallas_src>

<mosaic_0001>
module attributes {stable_mosaic.version = 11 : i64} {
  func.func @_mm_bias_kernel(%arg0: i32, %arg1: i32, %arg2: i32, %arg3: memref<16x256xf32, #tpu.memory_space<vmem>>, %arg4: memref<256x256xf32, #tpu.memory_space<vmem>>, %arg5: memref<1x256xf32, #tpu.memory_space<vmem>>, %arg6: memref<16x256xf32, #tpu.memory_space<vmem>>) attributes {dimension_semantics = [#tpu.dimension_semantics<parallel>, #tpu.dimension_semantics<parallel>, #tpu.dimension_semantics<arbitrary>], iteration_bounds = array<i64: 1, 1, 1>, scalar_prefetch = 0 : i64, scratch_operands = 0 : i64, tpu.core_type = #tpu.core_type<tc>, window_params = [{transform_indices = @transform_0, window_bounds = array<i64: 16, 256>}, {transform_indices = @transform_1, window_bounds = array<i64: 256, 256>}, {transform_indices = @transform_2, window_bounds = array<i64: 1, 256>}, {transform_indices = @transform_3, window_bounds = array<i64: 16, 256>}]} {
    %c0 = arith.constant 0 : index
    %c0_0 = arith.constant 0 : index
    %0 = vector.load %arg3[%c0, %c0_0] : memref<16x256xf32, #tpu.memory_space<vmem>>, vector<16x256xf32>
    %c0_1 = arith.constant 0 : index
    %c0_2 = arith.constant 0 : index
    %1 = vector.load %arg4[%c0_1, %c0_2] : memref<256x256xf32, #tpu.memory_space<vmem>>, vector<256x256xf32>
    %cst = arith.constant dense<0.000000e+00> : vector<16x256xf32>
    %2 = tpu.matmul %0, %1, %cst {dimension_numbers = #tpu.dot_dimension_numbers<[1], [0], [0], [1], [0, 0, 1, 1], [], []>} : vector<16x256xf32>, vector<256x256xf32>, vector<16x256xf32> -> vector<16x256xf32>
    %c0_i32 = arith.constant 0 : i32
    %3 = arith.cmpi eq, %arg2, %c0_i32 : i32
    %4 = arith.extui %3 : i1 to i32
    %c0_i32_3 = arith.constant 0 : i32
    %5 = arith.cmpi ne, %4, %c0_i32_3 : i32
    scf.if %5 {
      %c0_6 = arith.constant 0 : index
      %c0_7 = arith.constant 0 : index
      %9 = vector.load %arg5[%c0_6, %c0_7] : memref<1x256xf32, #tpu.memory_space<vmem>>, vector<1x256xf32>
      %10 = vector.broadcast %9 : vector<1x256xf32> to vector<16x256xf32>
      %11 = arith.addf %2, %10 : vector<16x256xf32>
      %c0_8 = arith.constant 0 : index
      %c0_9 = arith.constant 0 : index
      %12 = vector.load %arg6[%c0_8, %c0_9] : memref<16x256xf32, #tpu.memory_space<vmem>>, vector<16x256xf32>
      tpu.vector_store %arg6[%c0_8, %c0_9], %11 {strides = array<i32>} : memref<16x256xf32, #tpu.memory_space<vmem>>, vector<16x256xf32>,
    } else {
    }
    %c0_i32_4 = arith.constant 0 : i32
    %6 = arith.cmpi ne, %arg2, %c0_i32_4 : i32
    %7 = arith.extui %6 : i1 to i32
    %c0_i32_5 = arith.constant 0 : i32
    %8 = arith.cmpi ne, %7, %c0_i32_5 : i32
    scf.if %8 {
      %c0_6 = arith.constant 0 : index
      %c0_7 = arith.constant 0 : index
      %9 = vector.load %arg6[%c0_6, %c0_7] : memref<16x256xf32, #tpu.memory_space<vmem>>, vector<16x256xf32>
      %10 = arith.addf %9, %2 : vector<16x256xf32>
      %c0_8 = arith.constant 0 : index
      %c0_9 = arith.constant 0 : index
      %11 = vector.load %arg6[%c0_8, %c0_9] : memref<16x256xf32, #tpu.memory_space<vmem>>, vector<16x256xf32>
      tpu.vector_store %arg6[%c0_8, %c0_9], %10 {strides = array<i32>} : memref<16x256xf32, #tpu.memory_space<vmem>>, vector<16x256xf32>,
    } else {
    }
    return
  }
  func.func @transform_0(%arg0: i32, %arg1: i32, %arg2: i32) -> (i32, i32) {
    %c0_i32 = arith.constant 0 : i32
    return %arg0, %arg2 : i32, i32
  }
  func.func @transform_1(%arg0: i32, %arg1: i32, %arg2: i32) -> (i32, i32) {
    %c0_i32 = arith.constant 0 : i32
    return %arg2, %arg1 : i32, i32
  }
  func.func @transform_2(%arg0: i32, %arg1: i32, %arg2: i32) -> (i32, i32) {
    %c0_i32 = arith.constant 0 : i32
    %c0_i32_0 = arith.constant 0 : i32
    return %c0_i32, %arg1 : i32, i32
  }
  func.func @transform_3(%arg0: i32, %arg1: i32, %arg2: i32) -> (i32, i32) {
    %c0_i32 = arith.constant 0 : i32
    return %arg0, %arg1 : i32, i32
  }
}

</mosaic_0001>

<bundles_post_ra>
// kernel: tpu_custom_call.1
= control target key start
LH: loop header
LB: loop body
LE: loop exit
PB: predicated region body
PF: predicated region fallthrough
CT: control target
= control target key end

     0   :  { %8 = vsyncpa [#allocation3], 0  ;;  %s427_s0 = inlined_call_operand.hbm [shape: f32[16,256], index: 0, kind: input, shape index: {}]   ;;  %s428_s1 = inlined_call_operand.hbm [shape: f32[256,256], index: 1, kind: input, shape index: {}]   ;;  %s429_s2 = inlined_call_operand.vmem [shape: f32[1,256], index: 2, kind: input, shape index: {}]   ;;  %s430_s3 = inlined_call_operand.hbm [shape: f32[16,256], index: 3, kind: output, shape index: {}]  }
   0x1   :  { %9 = vsyncpa [#allocation6], 0 }
   0x2   :  { %10 = vsyncpa [#allocation4], 0  ;;  %s381_s12 = smov [#allocation2]  }
   0x3   :  { %s16_s13 = sshll.u32 %s381_s12, 4  ;;  %s17_s13 = int_to_ptr.vmem [resolvable:$true] %s16_s13 }
   0x4   :  { %s323_s14 = scalar_lea.vmem %s17_s13, 512  ;;  %p328_p1 = scmp.lt.s32.totalorder %s17_s13, %s17_s13 }
   0x5   :  { %p324_p0 = scmp.ne.s32.totalorder %s17_s13, %s323_s14  ;;  %p329_p2 = scmp.lt.s32.totalorder %s323_s14, %s323_s14 }
   0x7   :  { %p330_p3 = por %p329_p2, %p328_p1 }
   0x9   :  { %p331_p4 = pnand %p330_p3, %p324_p0 }
   0xb   :  { %334 = shalt.err (!%p331_p4)
}
   0xc   :  { %s382_s15 = smov 256   ;;  %s383_s16 = smov 16  }
   0xd   :  { %22 = dma.hbm_to_vmem [thread:$0]  %s427_s0, 512, %s17_s13, [#allocation3], %s382_s15, %s382_s15, %s383_s16  }
   0xe   :  { %s384_s19 = smov [#allocation5]  }
   0xf   :  { %s28_s20 = sshll.u32 %s384_s19, 4  ;;  %s29_s20 = int_to_ptr.vmem [resolvable:$true] %s28_s20 }
  0x10   :  { %s343_s21 = scalar_lea.vmem %s29_s20, 8192  ;;  %p348_p6 = scmp.lt.s32.totalorder %s29_s20, %s29_s20 }
  0x11   :  { %p344_p5 = scmp.ne.s32.totalorder %s29_s20, %s343_s21  ;;  %p349_p7 = scmp.lt.s32.totalorder %s343_s21, %s343_s21 }
  0x13   :  { %p350_p8 = por %p349_p7, %p348_p6 }
  0x15   :  { %p351_p9 = pnand %p350_p8, %p344_p5 }
  0x17   :  { %354 = shalt.err (!%p351_p9)
}
  0x18   :  { %34 = dma.hbm_to_vmem [thread:$0]  %s428_s1, 8192, %s29_s20, [#allocation6], %s382_s15, %s382_s15, %s383_s16  }
  0x19   :  { %375 = dma.done.wait [#allocation3], 512  }
  0x1a   :  { %376 = vsyncadd [#allocation3], 4294966784 }
  0x1b   :  { %377 = dma.done.wait [#allocation6], 8192  }
  0x1c   :  { %378 = vsyncadd [#allocation6], 4294959104  ;;  %v78_v0 = vld [vmem:[#allocation5 + $0xf8] sm:$0xff]  ;;  %v77_v1 = vld [vmem:[#allocation5 + $0xf0] sm:$0xff]  ;;  %s385_s24 = smov [#allocation7]  }
  0x1d   :  { %v76_v2 = vld [vmem:[#allocation5 + $0xe8] sm:$0xff]  ;;  %111 = vmatprep.subr.mxu0 %v78_v0  ;;  %246 = vmatprep.subr.mxu1 %v78_v0  ;;  %v75_v3 = vld [vmem:[#allocation5 + $0xe0] sm:$0xff]  ;;  %v74_v4 = vld [vmem:[#allocation5 + $0xd8] sm:$0xff]  ;;  %s233_s25 = sshll.u32 %s385_s24, 4  ;;  %s234_s25 = int_to_ptr.vmem [resolvable:$true] %s233_s25 }
  0x1e   :  { %112 = vmatpush1.msra.mxu0 %v77_v1  ;;  %278 = vmatpush1.msra.mxu1 %v77_v1  ;;  %v73_v5 = vld [vmem:[#allocation5 + $0xd0] sm:$0xff]  ;;  %v72_v6 = vld [vmem:[#allocation5 + $0xc8] sm:$0xff]  ;;  %v71_v7 = vld [vmem:[#allocation5 + $0xc0] sm:$0xff]  ;;  %s355_s26 = scalar_lea.vmem %s234_s25, 512  ;;  %p360_p11 = scmp.lt.s32.totalorder %s234_s25, %s234_s25 }
  0x1f   :  { %113 = vmatprep.subr.mxu0 %v76_v2  ;;  %247 = vmatprep.subr.mxu1 %v76_v2  ;;  %v70_v8 = vld [vmem:[#allocation5 + $0xb8] sm:$0xff]  ;;  %v69_v9 = vld [vmem:[#allocation5 + $0xb0] sm:$0xff]  ;;  %v68_v10 = vld [vmem:[#allocation5 + $0xa8] sm:$0xff]  ;;  %p356_p10 = scmp.ne.s32.totalorder %s234_s25, %s355_s26  ;;  %p361_p12 = scmp.lt.s32.totalorder %s355_s26, %s355_s26 }
  0x20   :  { %114 = vmatpush1.msra.mxu0 %v75_v3  ;;  %279 = vmatpush1.msra.mxu1 %v75_v3  ;;  %v67_v11 = vld [vmem:[#allocation5 + $0xa0] sm:$0xff]  ;;  %v66_v12 = vld [vmem:[#allocation5 + $0x98] sm:$0xff]  ;;  %v65_v13 = vld [vmem:[#allocation5 + $0x90] sm:$0xff] }
  0x21   :  { %115 = vmatprep.subr.mxu0 %v74_v4  ;;  %248 = vmatprep.subr.mxu1 %v74_v4  ;;  %v64_v14 = vld [vmem:[#allocation5 + $0x88] sm:$0xff]  ;;  %v63_v15 = vld [vmem:[#allocation5 + $0x80] sm:$0xff]  ;;  %v62_v16 = vld [vmem:[#allocation5 + $0x78] sm:$0xff]  ;;  %v194_v4 = vlaneseq  ;;  %p362_p13 = por %p361_p12, %p360_p11 }
  0x22   :  { %116 = vmatpush1.msra.mxu0 %v73_v5  ;;  %280 = vmatpush1.msra.mxu1 %v73_v5  ;;  %v61_v17 = vld [vmem:[#allocation5 + $0x70] sm:$0xff]  ;;  %v60_v18 = vld [vmem:[#allocation5 + $0x68] sm:$0xff]  ;;  %v59_v19 = vld [vmem:[#allocation5 + $0x60] sm:$0xff] }
  0x23   :  { %117 = vmatprep.subr.mxu0 %v72_v6  ;;  %249 = vmatprep.subr.mxu1 %v72_v6  ;;  %v58_v20 = vld [vmem:[#allocation5 + $0x58] sm:$0xff]  ;;  %v57_v21 = vld [vmem:[#allocation5 + $0x50] sm:$0xff]  ;;  %v56_v22 = vld [vmem:[#allocation5 + $0x48] sm:$0xff]  ;;  %v195_v5 = vshrl.u32 %v194_v4, 7  ;;  %p363_p0 = pnand %p362_p13, %p356_p10 }
  0x24   :  { %118 = vmatpush1.msra.mxu0 %v71_v7  ;;  %281 = vmatpush1.msra.mxu1 %v71_v7  ;;  %v55_v23 = vld [vmem:[#allocation5 + $0x40] sm:$0xff]  ;;  %v54_v24 = vld [vmem:[#allocation5 + $0x38] sm:$0xff]  ;;  %v53_v25 = vld [vmem:[#allocation5 + $0x30] sm:$0xff] }
  0x25   :  { %119 = vmatprep.subr.mxu0 %v70_v8  ;;  %250 = vmatprep.subr.mxu1 %v70_v8  ;;  %v52_v26 = vld [vmem:[#allocation5 + $0x28] sm:$0xff]  ;;  %v51_v27 = vld [vmem:[#allocation5 + $0x20] sm:$0xff]  ;;  %v50_v28 = vld [vmem:[#allocation5 + $0x18] sm:$0xff]  ;;  %v196_v6 = vsub.s32 0, %v195_v5  ;;  %v200_v8 = vsub.s32 1, %v195_v5 }
  0x26   :  { %120 = vmatpush1.msra.mxu0 %v69_v9  ;;  %282 = vmatpush1.msra.mxu1 %v69_v9  ;;  %v49_v29 = vld [vmem:[#allocation5 + $0x10] sm:$0xff]  ;;  %v48_v30 = vld [vmem:[#allocation5 + $0x8] sm:$0xff]  ;;  %v47_v31 = vld [vmem:[#allocation5] sm:$0xff] }
  0x27   :  { %121 = vmatprep.subr.mxu0 %v68_v10  ;;  %251 = vmatprep.subr.mxu1 %v68_v10  ;;  %v110_v32 = vld [vmem:[#allocation5 + $0x1f8] sm:$0xff]  ;;  %v109_v33 = vld [vmem:[#allocation5 + $0x1f0] sm:$0xff]  ;;  %v108_v34 = vld [vmem:[#allocation5 + $0x1e8] sm:$0xff] }
  0x28   :  { %122 = vmatpush1.msra.mxu0 %v67_v11  ;;  %283 = vmatpush1.msra.mxu1 %v67_v11  ;;  %v107_v35 = vld [vmem:[#allocation5 + $0x1e0] sm:$0xff]  ;;  %v106_v36 = vld [vmem:[#allocation5 + $0x1d8] sm:$0xff]  ;;  %v105_v37 = vld [vmem:[#allocation5 + $0x1d0] sm:$0xff] }
  0x29   :  { %123 = vmatprep.subr.mxu0 %v66_v12  ;;  %252 = vmatprep.subr.mxu1 %v66_v12  ;;  %v104_v38 = vld [vmem:[#allocation5 + $0x1c8] sm:$0xff]  ;;  %v103_v39 = vld [vmem:[#allocation5 + $0x1c0] sm:$0xff]  ;;  %v102_v40 = vld [vmem:[#allocation5 + $0x1b8] sm:$0xff] }
  0x2a   :  { %124 = vmatpush1.msra.mxu0 %v65_v13  ;;  %284 = vmatpush1.msra.mxu1 %v65_v13  ;;  %v101_v41 = vld [vmem:[#allocation5 + $0x1b0] sm:$0xff]  ;;  %v100_v42 = vld [vmem:[#allocation5 + $0x1a8] sm:$0xff]  ;;  %v99_v43 = vld [vmem:[#allocation5 + $0x1a0] sm:$0xff] }
  0x2b   :  { %125 = vmatprep.subr.mxu0 %v64_v14  ;;  %253 = vmatprep.subr.mxu1 %v64_v14  ;;  %v98_v44 = vld [vmem:[#allocation5 + $0x198] sm:$0xff]  ;;  %v97_v45 = vld [vmem:[#allocation5 + $0x190] sm:$0xff]  ;;  %v96_v46 = vld [vmem:[#allocation5 + $0x188] sm:$0xff] }
  0x2c   :  { %126 = vmatpush1.msra.mxu0 %v63_v15  ;;  %285 = vmatpush1.msra.mxu1 %v63_v15  ;;  %v95_v47 = vld [vmem:[#allocation5 + $0x180] sm:$0xff]  ;;  %v94_v48 = vld [vmem:[#allocation5 + $0x178] sm:$0xff]  ;;  %v93_v49 = vld [vmem:[#allocation5 + $0x170] sm:$0xff] }
  0x2d   :  { %127 = vmatprep.subr.mxu0 %v62_v16  ;;  %254 = vmatprep.subr.mxu1 %v62_v16  ;;  %v92_v50 = vld [vmem:[#allocation5 + $0x168] sm:$0xff]  ;;  %v91_v51 = vld [vmem:[#allocation5 + $0x160] sm:$0xff]  ;;  %v90_v52 = vld [vmem:[#allocation5 + $0x158] sm:$0xff] }
  0x2e   :  { %128 = vmatpush1.msra.mxu0 %v61_v17  ;;  %286 = vmatpush1.msra.mxu1 %v61_v17  ;;  %v89_v53 = vld [vmem:[#allocation5 + $0x150] sm:$0xff]  ;;  %v88_v54 = vld [vmem:[#allocation5 + $0x148] sm:$0xff]  ;;  %v87_v55 = vld [vmem:[#allocation5 + $0x140] sm:$0xff] }
  0x2f   :  { %129 = vmatprep.subr.mxu0 %v60_v18  ;;  %255 = vmatprep.subr.mxu1 %v60_v18  ;;  %v86_v56 = vld [vmem:[#allocation5 + $0x138] sm:$0xff]  ;;  %v85_v57 = vld [vmem:[#allocation5 + $0x130] sm:$0xff]  ;;  %v84_v58 = vld [vmem:[#allocation5 + $0x128] sm:$0xff] }
  0x30   :  { %130 = vmatpush1.msra.mxu0 %v59_v19  ;;  %287 = vmatpush1.msra.mxu1 %v59_v19  ;;  %v83_v59 = vld [vmem:[#allocation5 + $0x120] sm:$0xff]  ;;  %v82_v60 = vld [vmem:[#allocation5 + $0x118] sm:$0xff]  ;;  %v81_v61 = vld [vmem:[#allocation5 + $0x110] sm:$0xff] }
  0x31   :  { %131 = vmatprep.subr.mxu0 %v58_v20  ;;  %256 = vmatprep.subr.mxu1 %v58_v20  ;;  %v80_v62 = vld [vmem:[#allocation5 + $0x108] sm:$0xff]  ;;  %v79_v63 = vld [vmem:[#allocation5 + $0x100] sm:$0xff]  ;;  %v46_v1 = vld [vmem:[#allocation2 + $0x18] sm:$0xff] }
  0x32   :  { %132 = vmatpush1.msra.mxu0 %v57_v21  ;;  %288 = vmatpush1.msra.mxu1 %v57_v21  ;;  %v44_v0 = vld [vmem:[#allocation2 + $0x8] sm:$0xff]  ;;  %v43_v2 = vld [vmem:[#allocation2] sm:$0xff]  ;;  %v45_v3 = vld [vmem:[#allocation2 + $0x10] sm:$0xff] }
  0x33   :  { %133 = vmatprep.subr.mxu0 %v56_v22  ;;  %257 = vmatprep.subr.mxu1 %v56_v22  ;;  %v192_v7 = vld [vmem:[%s429_s2] sm:$0x3] }
  0x34   :  { %134 = vmatpush1.msra.mxu0 %v55_v23  ;;  %289 = vmatpush1.msra.mxu1 %v55_v23  ;;  %v197_v9 = vrot.slane %v192_v7, %v196_v6  ;;  %v201_v10 = vrot.slane %v192_v7, %v200_v8 }
  0x35   :  { %135 = vmatprep.subr.mxu0 %v54_v24  ;;  %258 = vmatprep.subr.mxu1 %v54_v24 }
  0x36   :  { %136 = vmatpush1.msra.mxu0 %v53_v25  ;;  %290 = vmatpush1.msra.mxu1 %v53_v25 }
  0x37   :  { %137 = vmatprep.subr.mxu0 %v52_v26  ;;  %259 = vmatprep.subr.mxu1 %v52_v26 }
  0x38   :  { %138 = vmatpush1.msra.mxu0 %v51_v27  ;;  %291 = vmatpush1.msra.mxu1 %v51_v27 }
  0x39   :  { %139 = vmatprep.subr.mxu0 %v50_v28  ;;  %260 = vmatprep.subr.mxu1 %v50_v28 }
  0x3a   :  { %140 = vmatpush1.msra.mxu0 %v49_v29  ;;  %292 = vmatpush1.msra.mxu1 %v49_v29 }
  0x3b   :  { %141 = vmatprep.subr.mxu0 %v48_v30  ;;  %261 = vmatprep.subr.mxu1 %v48_v30 }
  0x3c   :  { %142 = vmatpush1.msra.mxu0 %v47_v31  ;;  %293 = vmatpush1.msra.mxu1 %v47_v31 }
  0x3d   :  { %143 = vmatprep.subr.mxu0 %v110_v32  ;;  %262 = vmatprep.subr.mxu1 %v110_v32 }
  0x3e   :  { %144 = vmatpush2.msra.mxu0 %v109_v33  ;;  %294 = vmatpush2.msra.mxu1 %v109_v33 }
  0x3f   :  { %145 = vmatprep.subr.mxu0 %v108_v34  ;;  %263 = vmatprep.subr.mxu1 %v108_v34 }
  0x40   :  { %146 = vmatpush2.msra.mxu0 %v107_v35  ;;  %295 = vmatpush2.msra.mxu1 %v107_v35 }
  0x41   :  { %147 = vmatprep.subr.mxu0 %v106_v36  ;;  %264 = vmatprep.subr.mxu1 %v106_v36 }
  0x42   :  { %148 = vmatpush2.msra.mxu0 %v105_v37  ;;  %296 = vmatpush2.msra.mxu1 %v105_v37 }
  0x43   :  { %149 = vmatprep.subr.mxu0 %v104_v38  ;;  %265 = vmatprep.subr.mxu1 %v104_v38 }
  0x44   :  { %150 = vmatpush2.msra.mxu0 %v103_v39  ;;  %297 = vmatpush2.msra.mxu1 %v103_v39 }
  0x45   :  { %151 = vmatprep.subr.mxu0 %v102_v40  ;;  %266 = vmatprep.subr.mxu1 %v102_v40 }
  0x46   :  { %152 = vmatpush2.msra.mxu0 %v101_v41  ;;  %298 = vmatpush2.msra.mxu1 %v101_v41 }
  0x47   :  { %153 = vmatprep.subr.mxu0 %v100_v42  ;;  %267 = vmatprep.subr.mxu1 %v100_v42 }
  0x48   :  { %154 = vmatpush2.msra.mxu0 %v99_v43  ;;  %299 = vmatpush2.msra.mxu1 %v99_v43 }
  0x49   :  { %155 = vmatprep.subr.mxu0 %v98_v44  ;;  %268 = vmatprep.subr.mxu1 %v98_v44 }
  0x4a   :  { %156 = vmatpush2.msra.mxu0 %v97_v45  ;;  %300 = vmatpush2.msra.mxu1 %v97_v45 }
  0x4b   :  { %157 = vmatprep.subr.mxu0 %v96_v46  ;;  %269 = vmatprep.subr.mxu1 %v96_v46 }
  0x4c   :  { %158 = vmatpush2.msra.mxu0 %v95_v47  ;;  %301 = vmatpush2.msra.mxu1 %v95_v47 }
  0x4d   :  { %159 = vmatprep.subr.mxu0 %v94_v48  ;;  %270 = vmatprep.subr.mxu1 %v94_v48 }
  0x4e   :  { %160 = vmatpush2.msra.mxu0 %v93_v49  ;;  %302 = vmatpush2.msra.mxu1 %v93_v49 }
  0x4f   :  { %161 = vmatprep.subr.mxu0 %v92_v50  ;;  %271 = vmatprep.subr.mxu1 %v92_v50 }
  0x50   :  { %162 = vmatpush2.msra.mxu0 %v91_v51  ;;  %303 = vmatpush2.msra.mxu1 %v91_v51 }
  0x51   :  { %163 = vmatprep.subr.mxu0 %v90_v52  ;;  %272 = vmatprep.subr.mxu1 %v90_v52 }
  0x52   :  { %164 = vmatpush2.msra.mxu0 %v89_v53  ;;  %304 = vmatpush2.msra.mxu1 %v89_v53 }
  0x53   :  { %165 = vmatprep.subr.mxu0 %v88_v54  ;;  %273 = vmatprep.subr.mxu1 %v88_v54 }
  0x54   :  { %166 = vmatpush2.msra.mxu0 %v87_v55  ;;  %305 = vmatpush2.msra.mxu1 %v87_v55 }
  0x55   :  { %167 = vmatprep.subr.mxu0 %v86_v56  ;;  %274 = vmatprep.subr.mxu1 %v86_v56 }
  0x56   :  { %168 = vmatpush2.msra.mxu0 %v85_v57  ;;  %306 = vmatpush2.msra.mxu1 %v85_v57 }
  0x57   :  { %169 = vmatprep.subr.mxu0 %v84_v58  ;;  %275 = vmatprep.subr.mxu1 %v84_v58 }
  0x58   :  { %170 = vmatpush2.msra.mxu0 %v83_v59  ;;  %307 = vmatpush2.msra.mxu1 %v83_v59 }
  0x59   :  { %171 = vmatprep.subr.mxu0 %v82_v60  ;;  %276 = vmatprep.subr.mxu1 %v82_v60 }
  0x5a   :  { %172 = vmatpush2.msra.mxu0 %v81_v61  ;;  %308 = vmatpush2.msra.mxu1 %v81_v61 }
  0x5b   :  { %173 = vmatprep.subr.mxu0 %v80_v62  ;;  %277 = vmatprep.subr.mxu1 %v80_v62 }
  0x5c   :  { %174 = vmatpush2.msra.mxu0 %v79_v63  ;;  %309 = vmatpush2.msra.mxu1 %v79_v63 }
  0x5d   :  { %175 = vmatprep.mubr.f32.mxu0 %v44_v0  ;;  %181 = vmatprep.mubr.f32.mxu1 %v46_v1 }
  0x5e   :  { %176 = vmatmul.mubr.f32.vlgmr.msra.gmra.mxu0 %v43_v2  ;;  %182 = vmatmul.mubr.f32.vlgmr.msra.gmra.mxu1 %v45_v3 }
 0x11e   :  { %v177_v11 = vpop.f32.mrf.mxu0  ;;  %v183_v12 = vpop.f32.mrf.mxu1 }
 0x11f   :  { %v204_v13 = vadd.f32 %v197_v9, %v177_v11  ;;  %v206_v14 = vadd.f32 %v197_v9, %v183_v12 }
 0x120   :  { %v179_v15 = vpop.f32.mrf.mxu0  ;;  %v185_v16 = vpop.f32.mrf.mxu1 }
 0x121   :  { %208 = vst [vmem:[#allocation7] sm:$0xff] %v204_v13  ;;  %210 = vst [vmem:[#allocation7 + $0x10] sm:$0xff] %v206_v14  ;;  %v205_v17 = vadd.f32 %v201_v10, %v179_v15  ;;  %v207_v18 = vadd.f32 %v201_v10, %v185_v16 }
 0x123   :  { %209 = vst [vmem:[#allocation7 + $0x8] sm:$0xff] %v205_v17  ;;  %211 = vst [vmem:[#allocation7 + $0x18] sm:$0xff] %v207_v18 }
 0x124   :  { %366 = shalt.err (!%p363_p0)
}
 0x125   :  { %239 = dma.vmem_to_hbm [thread:$0]  %s234_s25, 512, %s430_s3, [#allocation4], %s382_s15, %s382_s15, %s383_s16  }
 0x126   :  { %379 = dma.done.wait [#allocation4], 512  }
 0x127   :  { %380 = vsyncadd [#allocation4], 4294966784 }
 0x128   :  { %243 = vsyncpa [#allocation3], 1 }
 0x129   :  { %244 = vsyncpa [#allocation6], 1 }
 0x12a   :  { %245 = vsyncpa [#allocation4], 1 }

</bundles_post_ra>
